<compile_context>
chip_gen: v7x
topology: tpu7x:2x2x1
jax: 0.10.0
libtpu: 0.0.40
codegen_flags: <defaults>
</compile_context>

<pallas_src>
import functools

import jax
import jax.numpy as jnp
from jax.experimental import pallas as pl
from jax.experimental.pallas import tpu as pltpu

EMBSIZE = 20
NUM_CLASSES = 10
NEG_SLOPE = 0.2
LANE = 128
_MiB = 1024 * 1024


def _round_up(n, m):
    return ((n + m - 1) // m) * m


def _leaky_relu(x):
    return jnp.where(x >= 0, x, NEG_SLOPE * x)


def _physical_vmem_bytes():
    try:
        return int(pltpu.get_tpu_info().vmem_capacity_bytes)
    except Exception:
        return 64 * _MiB  # conservative (v7x per-TC size)


# --------------------------------------------------------------------------
# Kernel: one batch tile of the full 4-layer MLP (+ fused class embedding).
# --------------------------------------------------------------------------
def mlp_generator_kernel(x_ref, y_ref,
                         w1x_ref, cls_ref,
                         w2_ref, b2_ref,
                         w3_ref, b3_ref,
                         w4_ref, b4_ref,
                         o_ref):
    cdt = w2_ref.dtype                          # matmul operand dtype (bf16/f32)

    x = x_ref[...].astype(cdt)                  # [TB, INp]
    y = y_ref[...]                              # [TB, 1] int32

    # one-hot(y) @ cls_table reproduces (emb[y] @ W1e.T + b1) exactly (each
    # one-hot row has a single 1); class dim is padded to 128 lanes.
    tb, clsp = y.shape[0], cls_ref.shape[0]
    classes = jax.lax.broadcasted_iota(jnp.int32, (tb, clsp), 1)
    onehot = (y == classes).astype(cls_ref.dtype)

    # fc1: torch.cat((x, emb)) folded into a split matmul; b1 lives in cls_table.
    h = (jnp.dot(x, w1x_ref[...], preferred_element_type=jnp.float32)
         + jnp.dot(onehot, cls_ref[...], preferred_element_type=jnp.float32))
    h = _leaky_relu(h)

    # fc2
    h = jnp.dot(h.astype(cdt), w2_ref[...],
                preferred_element_type=jnp.float32) + b2_ref[...]
    h = _leaky_relu(h)

    # fc3
    h = jnp.dot(h.astype(cdt), w3_ref[...],
                preferred_element_type=jnp.float32) + b3_ref[...]
    h = _leaky_relu(h)

    # fc4 + tanh
    out = jnp.dot(h.astype(cdt), w4_ref[...],
                  preferred_element_type=jnp.float32) + b4_ref[...]
    o_ref[...] = jnp.tanh(out).astype(o_ref.dtype)


# --------------------------------------------------------------------------
# Parameter init (PyTorch convention) + one-time repack for the kernel.
# --------------------------------------------------------------------------
def init_raw_params(key, input_dim, hidden_dim, output_dim):
    """PyTorch-style params: W stored [out, in]; emb ~ N(0, 1)."""
    in_dim = input_dim + EMBSIZE
    dims = [(in_dim, hidden_dim),
            (hidden_dim, hidden_dim * 2),
            (hidden_dim * 2, hidden_dim),
            (hidden_dim, output_dim)]
    keys = jax.random.split(key, 2 * len(dims) + 1)
    raw = {}
    for i, (fan_in, fan_out) in enumerate(dims):
        bound = 1.0 / jnp.sqrt(jnp.float32(fan_in))
        raw[f"w{i+1}"] = jax.random.uniform(
            keys[2 * i], (fan_out, fan_in), jnp.float32, -bound, bound)
        raw[f"b{i+1}"] = jax.random.uniform(
            keys[2 * i + 1], (fan_out,), jnp.float32, -bound, bound)
    raw["emb"] = jax.random.normal(keys[-1], (NUM_CLASSES, EMBSIZE), jnp.float32)
    return raw


def pack_params(raw, input_dim, hidden_dim, output_dim,
                param_dtype=jnp.bfloat16):
    """One-time repack for the kernel:
       * transpose to [in, out] and zero-pad feature dims to multiples of 128,
       * pre-fuse the class embedding + b1 into a per-class fc1 table,
       * matmul weights in param_dtype (bf16 default: MXU-native on every TPU
         generation, halves weight HBM traffic + VMEM); biases / cls_table f32.
    Zero padding keeps the math identical; padded output columns are sliced
    off in the wrapper."""
    INp = _round_up(input_dim, LANE)
    H1p = _round_up(hidden_dim, LANE)
    H2p = _round_up(hidden_dim * 2, LANE)
    H3p = _round_up(hidden_dim, LANE)
    OUTp = _round_up(output_dim, LANE)
    CLSp = _round_up(NUM_CLASSES, LANE)

    def pad_to(a, shape):
        out = jnp.zeros(shape, a.dtype)
        return out.at[tuple(slice(0, s) for s in a.shape)].set(a)

    w1_t = raw["w1"].T                        # [input_dim + EMBSIZE, hidden]
    w1x = w1_t[:input_dim]                    # [input_dim, hidden]
    w1e = w1_t[input_dim:]                    # [EMBSIZE,   hidden]
    # cls_table[c] = emb[c] @ W1e + b1  (computed once, f32, highest precision).
    cls = (jnp.dot(raw["emb"], w1e, precision=jax.lax.Precision.HIGHEST)
           + raw["b1"][None, :])

    # TODO(synk): optional fp8 quantization of w2/w3 (per-tensor scales) for the
    # v7x MXU; validate generator output quality before enabling.
    return {
        "w1x": pad_to(w1x, (INp, H1p)).astype(param_dtype),
        "cls": pad_to(cls, (CLSp, H1p)),                       # f32 (has b1)
        "w2": pad_to(raw["w2"].T, (H1p, H2p)).astype(param_dtype),
        "b2": pad_to(raw["b2"].reshape(1, -1), (1, H2p)),
        "w3": pad_to(raw["w3"].T, (H2p, H3p)).astype(param_dtype),
        "b3": pad_to(raw["b3"].reshape(1, -1), (1, H3p)),
        "w4": pad_to(raw["w4"].T, (H3p, OUTp)).astype(param_dtype),
        "b4": pad_to(raw["b4"].reshape(1, -1), (1, OUTp)),
    }


# --------------------------------------------------------------------------
# Forward wrapper.
# --------------------------------------------------------------------------
@functools.partial(jax.jit, static_argnames=("output_dim", "batch_tile"))
def mlp_generator_forward(params, x, y, *, output_dim, batch_tile=512):
    """x: [B, input_dim] f32, y: [B] int -> [B, output_dim] f32."""
    B, input_dim = x.shape
    INp, H1p = params["w1x"].shape
    H2p = params["w2"].shape[1]
    H3p = params["w3"].shape[1]
    OUTp = params["b4"].shape[1]
    CLSp = params["cls"].shape[0]

    # Batch tiling: at least 2 grid steps (engages the 2nd TensorCore on v7x
    # via the "parallel" axis) and TB derived from cdiv(B, steps) so batch
    # padding stays bounded.  16-row sublane multiple covers bf16 packing.
    sub = {4: 8, 2: 16, 1: 32}.get(params["w2"].dtype.itemsize, 16)
    num_tiles = max(2, pl.cdiv(B, batch_tile))
    TB = _round_up(pl.cdiv(B, num_tiles), sub)
    Bp = TB * num_tiles

    x = jnp.pad(x, ((0, Bp - B), (0, INp - input_dim)))
    y2 = jnp.pad(y.astype(jnp.int32), (0, Bp - B)).reshape(Bp, 1)

    batch_map = lambda i: (i, 0)
    const_map = lambda i: (0, 0)

    weight_names = ("w1x", "cls", "w2", "b2", "w3", "b3", "w4", "b4")
    weight_args = [params[n] for n in weight_names]
    # Constant index_map -> weights stay VMEM-resident across grid steps;
    # single-buffer them (default double-buffering would 2x their footprint).
    weight_specs = [pl.BlockSpec(a.shape, const_map, pipeline_mode=pl.Buffered(1))
                    for a in weight_args]

    # Explicit scoped-VMEM budget: resident weights (x1 buffer) + f32
    # intermediates + double-buffered x/y/out tiles, with 25% headroom,
    # capped safely below physical VMEM.
    weight_bytes = sum(int(a.size) * a.dtype.itemsize for a in weight_args)
    act_bytes = TB * (H1p + H2p + H3p + CLSp) * 4
    io_bytes = 2 * TB * (INp + 1 + OUTp) * 4
    vmem_needed = int(1.25 * (weight_bytes + act_bytes + io_bytes))
    vmem_limit = int(min(max(vmem_needed, 32 * _MiB),
                         int(0.9 * _physical_vmem_bytes())))

    flops = 2 * Bp * (INp * H1p + CLSp * H1p + H1p * H2p + H2p * H3p + H3p * OUTp)
    bytes_accessed = x.size * 4 + y2.size * 4 + Bp * OUTp * 4 + weight_bytes
    cost = pl.CostEstimate(flops=int(flops),
                           transcendentals=int(Bp * output_dim),
                           bytes_accessed=int(bytes_accessed))

    out_padded = pl.pallas_call(
        mlp_generator_kernel,
        out_shape=jax.ShapeDtypeStruct((Bp, OUTp), jnp.float32),
        grid=(num_tiles,),
        in_specs=[pl.BlockSpec((TB, INp), batch_map),
                  pl.BlockSpec((TB, 1), batch_map)] + weight_specs,
        out_specs=pl.BlockSpec((TB, OUTp), batch_map),
        compiler_params=pltpu.CompilerParams(
            dimension_semantics=("parallel",),
            vmem_limit_bytes=vmem_limit),
        cost_estimate=cost,
    )(x, y2, *weight_args)

    return out_padded[:B, :output_dim]


if __name__ == "__main__":
    input_dim, hidden_dim, output_dim = 32, 32, 16
    batch = 8

    key = jax.random.PRNGKey(0)
    k_param, k_x, k_y = jax.random.split(key, 3)

    raw = init_raw_params(k_param, input_dim, hidden_dim, output_dim)
    x = jax.random.normal(k_x, (batch, input_dim), jnp.float32)
    y = jax.random.randint(k_y, (batch,), 0, NUM_CLASSES, jnp.int32)

    # Pure-JAX reference with the original (PyTorch-convention) params.
    def ref(raw, x, y):
        h = jnp.concatenate([x, raw["emb"][y]], axis=1)
        for i in range(1, 4):
            h = h @ raw[f"w{i}"].T + raw[f"b{i}"]
            h = jnp.where(h >= 0, h, NEG_SLOPE * h)
        return jnp.tanh(h @ raw["w4"].T + raw["b4"])

    expected = ref(raw, x, y)

    # f32 weights: tight check.
    params_f32 = pack_params(raw, input_dim, hidden_dim, output_dim,
                             param_dtype=jnp.float32)
    out = jax.block_until_ready(
        mlp_generator_forward(params_f32, x, y, output_dim=output_dim))
    assert out.shape == (batch, output_dim)
    assert jnp.allclose(out, expected, atol=1e-4, rtol=1e-4), \
        float(jnp.max(jnp.abs(out - expected)))

    # bf16 weights (recommended default on all TPU generations): loose check.
    params_bf16 = pack_params(raw, input_dim, hidden_dim, output_dim)
    out_bf16 = jax.block_until_ready(
        mlp_generator_forward(params_bf16, x, y, output_dim=output_dim))
    assert jnp.allclose(out_bf16, expected, atol=5e-2, rtol=5e-2), \
        float(jnp.max(jnp.abs(out_bf16 - expected)))

    print("KERNEL_OK")
</pallas_src>

<mosaic_0001>
module attributes {stable_mosaic.version = 11 : i64} {
  func.func @mlp_generator_kernel(%arg0: i32, %arg1: memref<8x128xf32, #tpu.memory_space<vmem>>, %arg2: memref<8x1xi32, #tpu.memory_space<vmem>>, %arg3: memref<128x128xf32, #tpu.memory_space<vmem>>, %arg4: memref<128x128xf32, #tpu.memory_space<vmem>>, %arg5: memref<128x128xf32, #tpu.memory_space<vmem>>, %arg6: memref<1x128xf32, #tpu.memory_space<vmem>>, %arg7: memref<128x128xf32, #tpu.memory_space<vmem>>, %arg8: memref<1x128xf32, #tpu.memory_space<vmem>>, %arg9: memref<128x128xf32, #tpu.memory_space<vmem>>, %arg10: memref<1x128xf32, #tpu.memory_space<vmem>>, %arg11: memref<8x128xf32, #tpu.memory_space<vmem>>) attributes {dimension_semantics = [#tpu.dimension_semantics<parallel>], iteration_bounds = array<i64: 2>, scalar_prefetch = 0 : i64, scratch_operands = 0 : i64, tpu.core_type = #tpu.core_type<tc>, window_params = [{transform_indices = @transform_0, window_bounds = array<i64: 8, 128>}, {transform_indices = @transform_1, window_bounds = array<i64: 8, 1>}, {pipeline_mode = #tpu.pipeline_mode<synchronous>, transform_indices = @transform_2, window_bounds = array<i64: 128, 128>}, {pipeline_mode = #tpu.pipeline_mode<synchronous>, transform_indices = @transform_3, window_bounds = array<i64: 128, 128>}, {pipeline_mode = #tpu.pipeline_mode<synchronous>, transform_indices = @transform_4, window_bounds = array<i64: 128, 128>}, {pipeline_mode = #tpu.pipeline_mode<synchronous>, transform_indices = @transform_5, window_bounds = array<i64: 1, 128>}, {pipeline_mode = #tpu.pipeline_mode<synchronous>, transform_indices = @transform_6, window_bounds = array<i64: 128, 128>}, {pipeline_mode = #tpu.pipeline_mode<synchronous>, transform_indices = @transform_7, window_bounds = array<i64: 1, 128>}, {pipeline_mode = #tpu.pipeline_mode<synchronous>, transform_indices = @transform_8, window_bounds = array<i64: 128, 128>}, {pipeline_mode = #tpu.pipeline_mode<synchronous>, transform_indices = @transform_9, window_bounds = array<i64: 1, 128>}, {transform_indices = @transform_10, window_bounds = array<i64: 8, 128>}]} {
    %c0 = arith.constant 0 : index
    %c0_0 = arith.constant 0 : index
    %0 = vector.load %arg1[%c0, %c0_0] : memref<8x128xf32, #tpu.memory_space<vmem>>, vector<8x128xf32>
    %c0_1 = arith.constant 0 : index
    %c0_2 = arith.constant 0 : index
    %1 = vector.load %arg2[%c0_1, %c0_2] : memref<8x1xi32, #tpu.memory_space<vmem>>, vector<8x1xi32>
    %2 = tpu.iota {dimensions = array<i32: 1>} : vector<8x128xi32>
    %3 = vector.broadcast %1 : vector<8x1xi32> to vector<8x128xi32>
    %4 = arith.cmpi eq, %3, %2 : vector<8x128xi32>
    %5 = arith.extui %4 : vector<8x128xi1> to vector<8x128xi32>
    %6 = arith.sitofp %5 : vector<8x128xi32> to vector<8x128xf32>
    %c0_3 = arith.constant 0 : index
    %c0_4 = arith.constant 0 : index
    %7 = vector.load %arg3[%c0_3, %c0_4] : memref<128x128xf32, #tpu.memory_space<vmem>>, vector<128x128xf32>
    %cst = arith.constant dense<0.000000e+00> : vector<8x128xf32>
    %8 = tpu.matmul %0, %7, %cst {dimension_numbers = #tpu.dot_dimension_numbers<[1], [0], [0], [1], [0, 0, 1, 1], [], []>} : vector<8x128xf32>, vector<128x128xf32>, vector<8x128xf32> -> vector<8x128xf32>
    %c0_5 = arith.constant 0 : index
    %c0_6 = arith.constant 0 : index
    %9 = vector.load %arg4[%c0_5, %c0_6] : memref<128x128xf32, #tpu.memory_space<vmem>>, vector<128x128xf32>
    %cst_7 = arith.constant dense<0.000000e+00> : vector<8x128xf32>
    %10 = tpu.matmul %6, %9, %cst_7 {dimension_numbers = #tpu.dot_dimension_numbers<[1], [0], [0], [1], [0, 0, 1, 1], [], []>} : vector<8x128xf32>, vector<128x128xf32>, vector<8x128xf32> -> vector<8x128xf32>
    %11 = arith.addf %8, %10 : vector<8x128xf32>
    %cst_8 = arith.constant 0.000000e+00 : f32
    %12 = vector.broadcast %cst_8 : f32 to vector<8x128xf32>
    %13 = arith.cmpf oge, %11, %12 : vector<8x128xf32>
    %cst_9 = arith.constant 2.000000e-01 : f32
    %14 = vector.broadcast %cst_9 : f32 to vector<8x128xf32>
    %15 = arith.mulf %14, %11 : vector<8x128xf32>
    %16 = arith.select %13, %11, %15 : vector<8x128xi1>, vector<8x128xf32>
    %c0_10 = arith.constant 0 : index
    %c0_11 = arith.constant 0 : index
    %17 = vector.load %arg5[%c0_10, %c0_11] : memref<128x128xf32, #tpu.memory_space<vmem>>, vector<128x128xf32>
    %cst_12 = arith.constant dense<0.000000e+00> : vector<8x128xf32>
    %18 = tpu.matmul %16, %17, %cst_12 {dimension_numbers = #tpu.dot_dimension_numbers<[1], [0], [0], [1], [0, 0, 1, 1], [], []>} : vector<8x128xf32>, vector<128x128xf32>, vector<8x128xf32> -> vector<8x128xf32>
    %c0_13 = arith.constant 0 : index
    %c0_14 = arith.constant 0 : index
    %19 = vector.load %arg6[%c0_13, %c0_14] : memref<1x128xf32, #tpu.memory_space<vmem>>, vector<1x128xf32>
    %20 = vector.broadcast %19 : vector<1x128xf32> to vector<8x128xf32>
    %21 = arith.addf %18, %20 : vector<8x128xf32>
    %cst_15 = arith.constant 0.000000e+00 : f32
    %22 = vector.broadcast %cst_15 : f32 to vector<8x128xf32>
    %23 = arith.cmpf oge, %21, %22 : vector<8x128xf32>
    %cst_16 = arith.constant 2.000000e-01 : f32
    %24 = vector.broadcast %cst_16 : f32 to vector<8x128xf32>
    %25 = arith.mulf %24, %21 : vector<8x128xf32>
    %26 = arith.select %23, %21, %25 : vector<8x128xi1>, vector<8x128xf32>
    %c0_17 = arith.constant 0 : index
    %c0_18 = arith.constant 0 : index
    %27 = vector.load %arg7[%c0_17, %c0_18] : memref<128x128xf32, #tpu.memory_space<vmem>>, vector<128x128xf32>
    %cst_19 = arith.constant dense<0.000000e+00> : vector<8x128xf32>
    %28 = tpu.matmul %26, %27, %cst_19 {dimension_numbers = #tpu.dot_dimension_numbers<[1], [0], [0], [1], [0, 0, 1, 1], [], []>} : vector<8x128xf32>, vector<128x128xf32>, vector<8x128xf32> -> vector<8x128xf32>
    %c0_20 = arith.constant 0 : index
    %c0_21 = arith.constant 0 : index
    %29 = vector.load %arg8[%c0_20, %c0_21] : memref<1x128xf32, #tpu.memory_space<vmem>>, vector<1x128xf32>
    %30 = vector.broadcast %29 : vector<1x128xf32> to vector<8x128xf32>
    %31 = arith.addf %28, %30 : vector<8x128xf32>
    %cst_22 = arith.constant 0.000000e+00 : f32
    %32 = vector.broadcast %cst_22 : f32 to vector<8x128xf32>
    %33 = arith.cmpf oge, %31, %32 : vector<8x128xf32>
    %cst_23 = arith.constant 2.000000e-01 : f32
    %34 = vector.broadcast %cst_23 : f32 to vector<8x128xf32>
    %35 = arith.mulf %34, %31 : vector<8x128xf32>
    %36 = arith.select %33, %31, %35 : vector<8x128xi1>, vector<8x128xf32>
    %c0_24 = arith.constant 0 : index
    %c0_25 = arith.constant 0 : index
    %37 = vector.load %arg9[%c0_24, %c0_25] : memref<128x128xf32, #tpu.memory_space<vmem>>, vector<128x128xf32>
    %cst_26 = arith.constant dense<0.000000e+00> : vector<8x128xf32>
    %38 = tpu.matmul %36, %37, %cst_26 {dimension_numbers = #tpu.dot_dimension_numbers<[1], [0], [0], [1], [0, 0, 1, 1], [], []>} : vector<8x128xf32>, vector<128x128xf32>, vector<8x128xf32> -> vector<8x128xf32>
    %c0_27 = arith.constant 0 : index
    %c0_28 = arith.constant 0 : index
    %39 = vector.load %arg10[%c0_27, %c0_28] : memref<1x128xf32, #tpu.memory_space<vmem>>, vector<1x128xf32>
    %40 = vector.broadcast %39 : vector<1x128xf32> to vector<8x128xf32>
    %41 = arith.addf %38, %40 : vector<8x128xf32>
    %42 = math.tanh %41 : vector<8x128xf32>
    %c0_29 = arith.constant 0 : index
    %c0_30 = arith.constant 0 : index
    %43 = vector.load %arg11[%c0_29, %c0_30] : memref<8x128xf32, #tpu.memory_space<vmem>>, vector<8x128xf32>
    tpu.vector_store %arg11[%c0_29, %c0_30], %42 {strides = array<i32>} : memref<8x128xf32, #tpu.memory_space<vmem>>, vector<8x128xf32>,
    return
  }
  func.func @transform_0(%arg0: i32) -> (i32, i32) {
    %c0_i32 = arith.constant 0 : i32
    %c0_i32_0 = arith.constant 0 : i32
    return %arg0, %c0_i32 : i32, i32
  }
  func.func @transform_1(%arg0: i32) -> (i32, i32) {
    %c0_i32 = arith.constant 0 : i32
    %c0_i32_0 = arith.constant 0 : i32
    return %arg0, %c0_i32 : i32, i32
  }
  func.func @transform_2(%arg0: i32) -> (i32, i32) {
    %c0_i32 = arith.constant 0 : i32
    %c0_i32_0 = arith.constant 0 : i32
    %c0_i32_1 = arith.constant 0 : i32
    return %c0_i32, %c0_i32_0 : i32, i32
  }
  func.func @transform_3(%arg0: i32) -> (i32, i32) {
    %c0_i32 = arith.constant 0 : i32
    %c0_i32_0 = arith.constant 0 : i32
    %c0_i32_1 = arith.constant 0 : i32
    return %c0_i32, %c0_i32_0 : i32, i32
  }
  func.func @transform_4(%arg0: i32) -> (i32, i32) {
    %c0_i32 = arith.constant 0 : i32
    %c0_i32_0 = arith.constant 0 : i32
    %c0_i32_1 = arith.constant 0 : i32
    return %c0_i32, %c0_i32_0 : i32, i32
  }
  func.func @transform_5(%arg0: i32) -> (i32, i32) {
    %c0_i32 = arith.constant 0 : i32
    %c0_i32_0 = arith.constant 0 : i32
    %c0_i32_1 = arith.constant 0 : i32
    return %c0_i32, %c0_i32_0 : i32, i32
  }
  func.func @transform_6(%arg0: i32) -> (i32, i32) {
    %c0_i32 = arith.constant 0 : i32
    %c0_i32_0 = arith.constant 0 : i32
    %c0_i32_1 = arith.constant 0 : i32
    return %c0_i32, %c0_i32_0 : i32, i32
  }
  func.func @transform_7(%arg0: i32) -> (i32, i32) {
    %c0_i32 = arith.constant 0 : i32
    %c0_i32_0 = arith.constant 0 : i32
    %c0_i32_1 = arith.constant 0 : i32
    return %c0_i32, %c0_i32_0 : i32, i32
  }
  func.func @transform_8(%arg0: i32) -> (i32, i32) {
    %c0_i32 = arith.constant 0 : i32
    %c0_i32_0 = arith.constant 0 : i32
    %c0_i32_1 = arith.constant 0 : i32
    return %c0_i32, %c0_i32_0 : i32, i32
  }
  func.func @transform_9(%arg0: i32) -> (i32, i32) {
    %c0_i32 = arith.constant 0 : i32
    %c0_i32_0 = arith.constant 0 : i32
    %c0_i32_1 = arith.constant 0 : i32
    return %c0_i32, %c0_i32_0 : i32, i32
  }
  func.func @transform_10(%arg0: i32) -> (i32, i32) {
    %c0_i32 = arith.constant 0 : i32
    %c0_i32_0 = arith.constant 0 : i32
    return %arg0, %c0_i32 : i32, i32
  }
}

</mosaic_0001>

<bundles_post_ra>
// kernel: mlp_generator_forward.1
= control target key start
LH: loop header
LB: loop body
LE: loop exit
PB: predicated region body
PF: predicated region fallthrough
CT: control target
= control target key end

     0   :  { %15 = vsyncpa [#allocation3], 0  ;;  %s1985_s0 = inlined_call_operand.vmem [shape: f32[16,128], index: 0, kind: input, shape index: {}]   ;;  %s1986_s1 = inlined_call_operand.vmem [shape: s32[16,1], index: 1, kind: input, shape index: {}]   ;;  %s1987_s2 = inlined_call_operand.hbm [shape: f32[128,128], index: 2, kind: input, shape index: {}]   ;;  %s1988_s3 = inlined_call_operand.hbm [shape: f32[128,128], index: 3, kind: input, shape index: {}]   ;;  %s1989_s4 = inlined_call_operand.hbm [shape: f32[128,128], index: 4, kind: input, shape index: {}]   ;;  %s1990_s5 = inlined_call_operand.vmem [shape: f32[1,128], index: 5, kind: input, shape index: {}]   ;;  %s1991_s6 = inlined_call_operand.hbm [shape: f32[128,128], index: 6, kind: input, shape index: {}]   ;;  %s1992_s7 = inlined_call_operand.vmem [shape: f32[1,128], index: 7, kind: input, shape index: {}]   ;;  %s1993_s8 = inlined_call_operand.hbm [shape: f32[128,128], index: 8, kind: input, shape index: {}]   ;;  %s1994_s9 = inlined_call_operand.vmem [shape: f32[1,128], index: 9, kind: input, shape index: {}]   ;;  %s1995_s10 = inlined_call_operand.vmem [shape: f32[16,128], index: 10, kind: output, shape index: {}]  }
   0x1   :  { %16 = vsyncpa [#allocation5], 0 }
   0x2   :  { %17 = vsyncpa [#allocation8], 0  ;;  %s1735_s13 = smov 0  }
   0x3 LB: > { %s1741_s14 = sadd.s32 4294967295, %s1666_s13   ;;  %p1034_p0 = scmp.ge.s32.totalorder %s1666_s13, 1  ;;  %s1666_s13 = sphi %s1735_s13, %s23_s13  }
   0x4   : > { %p274_p1 = scmp.lt.s32.totalorder %s1666_s13, 3  ;;  %p1996_p2 = scmp.eq.s32.totalorder %s1741_s14, 0 }
   0x5   : > { %s1668_s16 = smov [#allocation4]   ;;  %s1669_s18 = smov [#allocation7]  }
   0x6   : > { %p1746_p3 = pnand %p1034_p0, %p274_p1  ;;  %s299_s17 = sshll.u32 %s1668_s16, 4  ;;  %s1750_s17 = int_to_ptr.vmem [resolvable:$true] %s299_s17 }
   0x7   : > { %s328_s19 = sshll.u32 %s1669_s18, 4  ;;  %s1670_s21 = smov [#allocation2]   ;;  %s1754_s19 = int_to_ptr.vmem [resolvable:$true] %s328_s19 }
   0x8   : > { %s1998_s15 = scalar_select %p1746_p3, 1, 0 }
   0x9   : > { %p1459_p4 = pneg %p1746_p3  ;;  %s286_s22 = sshll.u32 %s1670_s21, 4  ;;  %s1762_s22 = int_to_ptr.vmem [resolvable:$true] %s286_s22 }
   0xa   : > { %s1671_s23 = smov [#allocation6]   ;;  %s1508_s27 = scalar_lea.hbm %s1988_s3, 2048 }
   0xb   : > { %p1758_p5 = pnand %p1996_p2, %p1459_p4  ;;  %s1764_s24 = sshll.u32 %s1671_s23, 4  ;;  %s313_s24 = int_to_ptr.vmem [resolvable:$true] %s1764_s24 }
   0xc   : > { %p1509_p6 = scmp.ne.s32.totalorder %s1988_s3, %s1508_s27  ;;  %p1515_p10 = scmp.lt.u32.totalorder %s1508_s27, %s1988_s3 }
   0xd   : > { %p1774_p7 = pneg %p1758_p5 }
   0xf   : > { %p1511_p8 = pnand %p1774_p7, %p1509_p6 }
  0x11   : > { %p1512_p9 = pneg %p1511_p8 }
  0x13   : > { %p1517_p11 = pnand %p1515_p10, %p1512_p9 }
  0x15   : > { %1520 = shalt.err (!%p1517_p11)
}
  0x16   : > { %s1521_s16 = scalar_lea.vmem %s1750_s17, 2048  ;;  %p1529_p1 = scmp.lt.s32.totalorder %s1750_s17, %s1750_s17 }
  0x17   : > { %p1522_p12 = scmp.ne.s32.totalorder %s1750_s17, %s1521_s16  ;;  %p1530_p4 = scmp.lt.s32.totalorder %s1521_s16, %s1521_s16 }
  0x19   : > { %p1524_p13 = pnand %p1522_p12, %p1774_p7  ;;  %p1531_p6 = por %p1530_p4, %p1529_p1 }
  0x1b   : > { %p1525_p0 = pneg %p1524_p13 }
  0x1d   : > { %p1532_p8 = pnand %p1531_p6, %p1525_p0 }
  0x1f   : > { %1535 = shalt.err (!%p1532_p8)
}
  0x20   : > { %s1672_s18 = smov 128   ;;  %s1673_s21 = smov 8  }
  0x21   : > { %1465 = dma.hbm_to_vmem [thread:$0]  (!%p1758_p5), %s1988_s3, 2048, %s1750_s17, [#allocation5], %s1672_s18, %s1672_s18, %s1673_s21  }
  0x22   : > { %s1536_s28 = scalar_lea.hbm %s1991_s6, 2048 }
  0x23   : > { %p1537_p9 = scmp.ne.s32.totalorder %s1991_s6, %s1536_s28  ;;  %p1543_p12 = scmp.lt.u32.totalorder %s1536_s28, %s1991_s6 }
  0x25   : > { %p1539_p10 = pnand %p1537_p9, %p1774_p7 }
  0x27   : > { %p1540_p11 = pneg %p1539_p10 }
  0x29   : > { %p1545_p13 = pnand %p1543_p12, %p1540_p11 }
  0x2b   : > { %1548 = shalt.err (!%p1545_p13)
}
  0x2c   : > { %s1549_s17 = scalar_lea.vmem %s1754_s19, 2048  ;;  %p1557_p6 = scmp.lt.s32.totalorder %s1754_s19, %s1754_s19 }
  0x2d   : > { %p1550_p0 = scmp.ne.s32.totalorder %s1754_s19, %s1549_s17  ;;  %p1558_p8 = scmp.lt.s32.totalorder %s1549_s17, %s1549_s17 }
  0x2f   : > { %p1552_p1 = pnand %p1550_p0, %p1774_p7  ;;  %p1559_p9 = por %p1558_p8, %p1557_p6 }
  0x31   : > { %p1553_p4 = pneg %p1552_p1 }
  0x33   : > { %p1560_p10 = pnand %p1559_p9, %p1553_p4 }
  0x35   : > { %1563 = shalt.err (!%p1560_p10)
}
  0x36   : > { %1471 = dma.hbm_to_vmem [thread:$0]  (!%p1758_p5), %s1991_s6, 2048, %s1754_s19, [#allocation8], %s1672_s18, %s1672_s18, %s1673_s21  }
  0x37   : > { %s1564_s28 = scalar_lea.hbm %s1987_s2, 2048 }
  0x38   : > { %p1565_p11 = scmp.ne.s32.totalorder %s1987_s2, %s1564_s28  ;;  %p1571_p0 = scmp.lt.u32.totalorder %s1564_s28, %s1987_s2 }
  0x3a   : > { %p1567_p12 = pnand %p1565_p11, %p1774_p7 }
  0x3c   : > { %p1568_p13 = pneg %p1567_p12 }
  0x3e   : > { %p1573_p1 = pnand %p1571_p0, %p1568_p13 }
  0x40   : > { %1576 = shalt.err (!%p1573_p1)
}
  0x41   : > { %s1577_s19 = scalar_lea.vmem %s1762_s22, 2048  ;;  %p1585_p9 = scmp.lt.s32.totalorder %s1762_s22, %s1762_s22 }
  0x42   : > { %p1578_p4 = scmp.ne.s32.totalorder %s1762_s22, %s1577_s19  ;;  %p1586_p10 = scmp.lt.s32.totalorder %s1577_s19, %s1577_s19 }
  0x44   : > { %p1580_p6 = pnand %p1578_p4, %p1774_p7  ;;  %p1587_p11 = por %p1586_p10, %p1585_p9 }
  0x46   : > { %p1581_p8 = pneg %p1580_p6 }
  0x48   : > { %p1588_p12 = pnand %p1587_p11, %p1581_p8 }
  0x4a   : > { %1591 = shalt.err (!%p1588_p12)
}
  0x4b   : > { %1462 = dma.hbm_to_vmem [thread:$0]  (!%p1758_p5), %s1987_s2, 2048, %s1762_s22, [#allocation3], %s1672_s18, %s1672_s18, %s1673_s21  }
  0x4c   : > { %s1592_s27 = scalar_lea.hbm %s1989_s4, 2048 }
  0x4d   : > { %p1593_p13 = scmp.ne.s32.totalorder %s1989_s4, %s1592_s27  ;;  %p1599_p4 = scmp.lt.u32.totalorder %s1592_s27, %s1989_s4 }
  0x4f   : > { %p1595_p0 = pnand %p1593_p13, %p1774_p7 }
  0x51   : > { %p1596_p1 = pneg %p1595_p0 }
  0x53   : > { %p1601_p6 = pnand %p1599_p4, %p1596_p1 }
  0x55   : > { %1604 = shalt.err (!%p1601_p6)
}
  0x56   : > { %s1605_s16 = scalar_lea.vmem %s313_s24, 2048  ;;  %p1613_p11 = scmp.lt.s32.totalorder %s313_s24, %s313_s24 }
  0x57   : > { %p1606_p8 = scmp.ne.s32.totalorder %s313_s24, %s1605_s16  ;;  %p1614_p12 = scmp.lt.s32.totalorder %s1605_s16, %s1605_s16 }
  0x59   : > { %p1608_p9 = pnand %p1606_p8, %p1774_p7  ;;  %p1615_p2 = por %p1614_p12, %p1613_p11 }
  0x5b   : > { %p1609_p10 = pneg %p1608_p9 }
  0x5d   : > { %p1616_p3 = pnand %p1615_p2, %p1609_p10 }
  0x5f   : > { %1619 = shalt.err (!%p1616_p3)
}
  0x60   : > { %1468 = dma.hbm_to_vmem [thread:$0]  (!%p1758_p5), %s1989_s4, 2048, %s313_s24, [#allocation5], %s1672_s18, %s1672_s18, %s1673_s21  }
  0x61   : > { %s1674_s17 = smov [#allocation9]   ;;  %s1620_s27 = scalar_lea.hbm %s1993_s8, 2048 }
  0x62   : > { %s344_s23 = sshll.u32 %s1674_s17, 4  ;;  %p1621_p2 = scmp.ne.s32.totalorder %s1993_s8, %s1620_s27  ;;  %s345_s23 = int_to_ptr.vmem [resolvable:$true] %s344_s23 }
  0x63   : > { %p1627_p0 = scmp.lt.u32.totalorder %s1620_s27, %s1993_s8 }
  0x64   : > { %p1623_p3 = pnand %p1621_p2, %p1774_p7 }
  0x66   : > { %p1624_p13 = pneg %p1623_p3 }
  0x68   : > { %p1629_p1 = pnand %p1627_p0, %p1624_p13 }
  0x6a   : > { %1632 = shalt.err (!%p1629_p1)
}
  0x6b   : > { %s1633_s24 = scalar_lea.vmem %s345_s23, 2048  ;;  %p1641_p9 = scmp.lt.s32.totalorder %s345_s23, %s345_s23 }
  0x6c   : > { %p1634_p4 = scmp.ne.s32.totalorder %s345_s23, %s1633_s24  ;;  %p1642_p10 = scmp.lt.s32.totalorder %s1633_s24, %s1633_s24 }
  0x6e   : > { %p1636_p6 = pnand %p1634_p4, %p1774_p7  ;;  %p1643_p11 = por %p1642_p10, %p1641_p9 }
  0x70   : > { %p1637_p8 = pneg %p1636_p6 }
  0x72   : > { %p1644_p12 = pnand %p1643_p11, %p1637_p8 }
  0x74   : > { %1647 = shalt.err (!%p1644_p12)
}
  0x75   : > { %1474 = dma.hbm_to_vmem [thread:$0]  (!%p1758_p5), %s1993_s8, 2048, %s345_s23, [#allocation8], %s1672_s18, %s1672_s18, %s1673_s21  }
  0x76   : > { %p2001_p2 = scmp.ne.s32.totalorder %s1998_s15, 0 }
  0x77   : > { %p2002_p7 = scmp.eq.s32.totalorder (!%p2001_p2), %s1741_s14, 0 }
  0x78   : > { %377 = sbr.rel (%p2001_p2) target bundleno = 1177 (0x499), region = 60 }
  0x7f   : > { %1653 = dma.done.wait (%p2002_p7), [#allocation3], 2048   ;;  %p2003_p3 = pmov %p2002_p7 }
  0x81   : > { %1655 = vsyncadd (%p2003_p3), [#allocation3], 4294965248  ;;  %p2004_p13 = pmov %p2003_p3 }
  0x82   : > { %p2005_p0 = pmov %p2003_p3 }
  0x83   : > { %1657 = dma.done.wait (%p2004_p13), [#allocation5], 4096  }
  0x84   : > { %1659 = vsyncadd (%p2005_p0), [#allocation5], 4294963200  ;;  %p2006_p1 = pmov %p2005_p0 }
  0x85   : > { %p2007_p5 = pmov %p2005_p0 }
  0x86   : > { %1661 = dma.done.wait (%p2006_p1), [#allocation8], 4096  }
  0x87   : > { %1663 = vsyncadd (%p2007_p5), [#allocation8], 4294963200  ;;  %p433_p4 = scmp.lt.s32.totalorder %s1741_s14, 1  ;;  %v1675_v0 = vmov 0   ;;  %v1676_v1 = vmov 0.0|0.0   ;;  %v471_v3 = vld [vmem:[#allocation4] sm:$0xff]  ;;  %v447_v49 = vlaneseq }
  0x88   : > { %1505 = vset.pattern.permute.xlu0 %v1675_v0  ;;  %1317 = vmatprep.subr.bf16.mxu0 %v1676_v1  ;;  %v472_v4 = vld [vmem:[#allocation4 + $0x8] sm:$0xff]  ;;  %v473_v6 = vld [vmem:[#allocation4 + $0x10] sm:$0xff]  ;;  %v474_v7 = vld [vmem:[#allocation4 + $0x18] sm:$0xff]  ;;  %vm1677_vm0 = vmmov 0   ;;  %v1678_v8 = vmov 0.0   ;;  %v1679_v57 = vmov 1.0  }
  0x89   : > { %s2009_s14 = smov (!%p433_p4, %s1741_s14), 1  ;;  %1365 = vmatprep.subr.bf16.mxu1 %v1676_v1  ;;  %v1318_v5 = vpack.c.bf16 %v472_v4, %v471_v3  ;;  %1174 = vmatprep.mubr.msk.f32.mxu0 %vm1677_vm0, %v1678_v8  ;;  %v1321_v9 = vpack.c.bf16 %v474_v7, %v473_v6  ;;  %v475_v10 = vld [vmem:[#allocation4 + $0x20] sm:$0xff]  ;;  %v476_v11 = vld [vmem:[#allocation4 + $0x28] sm:$0xff]  ;;  %v477_v13 = vld [vmem:[#allocation4 + $0x30] sm:$0xff]  ;;  %v448_v52 = vand.u32 127, %v447_v49 }
  0x8a   : > { %s1911_s15 = sshll.u32 %s2009_s14, 3  ;;  %1244 = vmatprep.mubr.msk.f32.mxu1 %vm1677_vm0, %v1678_v8  ;;  %v1324_v12 = vpack.c.bf16 %v476_v11, %v475_v10  ;;  %v478_v14 = vld [vmem:[#allocation4 + $0x38] sm:$0xff]  ;;  %v479_v16 = vld [vmem:[#allocation4 + $0x40] sm:$0xff]  ;;  %v480_v17 = vld [vmem:[#allocation4 + $0x48] sm:$0xff] }
  0x8b   : > { %s440_s18 = scalar_lea.vmem %s1986_s1, %s1911_s15  ;;  %1319 = vmatpush3.bf16.msra.mxu0 %v1318_v5  ;;  %v1327_v15 = vpack.c.bf16 %v478_v14, %v477_v13  ;;  %v1330_v18 = vpack.c.bf16 %v480_v17, %v479_v16  ;;  %v481_v19 = vld [vmem:[#allocation4 + $0x50] sm:$0xff]  ;;  %v482_v20 = vld [vmem:[#allocation4 + $0x58] sm:$0xff]  ;;  %v483_v22 = vld [vmem:[#allocation4 + $0x60] sm:$0xff]  ;;  %s436_s19 = scalar_lea.vmem %s1985_s0, %s1911_s15 }
  0x8c   : > { %v446_v2 = vld [vmem:[%s440_s18] sm:$0xff]  ;;  %1320 = vmatprep.subr.bf16.mxu0 %v1676_v1  ;;  %v1333_v21 = vpack.c.bf16 %v482_v20, %v481_v19  ;;  %v484_v23 = vld [vmem:[#allocation4 + $0x68] sm:$0xff]  ;;  %v485_v25 = vld [vmem:[#allocation4 + $0x70] sm:$0xff]  ;;  %s444_s12 = scalar_lea.vmem %s1995_s10, %s1911_s15 }
  0x8d   : > { %450 = vperm.xlu0 %1505, %v446_v2   ;;  %v1336_v24 = vpack.c.bf16 %v484_v23, %v483_v22  ;;  %v486_v26 = vld [vmem:[#allocation4 + $0x78] sm:$0xff]  ;;  %v630_v28 = vld [vmem:[#allocation6] sm:$0xff]  ;;  %v631_v29 = vld [vmem:[#allocation6 + $0x8] sm:$0xff] }
  0x8e   : > { %v1339_v27 = vpack.c.bf16 %v486_v26, %v485_v25  ;;  %v632_v30 = vld [vmem:[#allocation6 + $0x10] sm:$0xff]  ;;  %v1366_v31 = vpack.c.bf16 %v631_v29, %v630_v28  ;;  %v633_v32 = vld [vmem:[#allocation6 + $0x18] sm:$0xff]  ;;  %v634_v34 = vld [vmem:[#allocation6 + $0x20] sm:$0xff] }
  0x8f   : > { %1322 = vmatpush3.bf16.msra.mxu0 %v1321_v9  ;;  %v1369_v33 = vpack.c.bf16 %v633_v32, %v632_v30  ;;  %v635_v35 = vld [vmem:[#allocation6 + $0x28] sm:$0xff]  ;;  %v636_v37 = vld [vmem:[#allocation6 + $0x30] sm:$0xff]  ;;  %v637_v38 = vld [vmem:[#allocation6 + $0x38] sm:$0xff] }
  0x90   : > { %1323 = vmatprep.subr.bf16.mxu0 %v1676_v1  ;;  %1367 = vmatpush3.bf16.msra.mxu1 %v1366_v31  ;;  %v1372_v36 = vpack.c.bf16 %v635_v35, %v634_v34  ;;  %v1375_v39 = vpack.c.bf16 %v637_v38, %v636_v37  ;;  %v638_v40 = vld [vmem:[#allocation6 + $0x40] sm:$0xff]  ;;  %v639_v41 = vld [vmem:[#allocation6 + $0x48] sm:$0xff]  ;;  %v640_v43 = vld [vmem:[#allocation6 + $0x50] sm:$0xff] }
  0x91   : > { %1368 = vmatprep.subr.bf16.mxu1 %v1676_v1  ;;  %v1378_v42 = vpack.c.bf16 %v639_v41, %v638_v40  ;;  %v641_v44 = vld [vmem:[#allocation6 + $0x58] sm:$0xff]  ;;  %v642_v46 = vld [vmem:[#allocation6 + $0x60] sm:$0xff]  ;;  %v643_v47 = vld [vmem:[#allocation6 + $0x68] sm:$0xff] }
  0x92   : > { %v1381_v45 = vpack.c.bf16 %v641_v44, %v640_v43  ;;  %v1384_v48 = vpack.c.bf16 %v643_v47, %v642_v46  ;;  %v455_v50 = vld [vmem:[#allocation2] sm:$0xff]  ;;  %v456_v51 = vld [vmem:[#allocation2 + $0x8] sm:$0xff]  ;;  %v457_v55 = vld [vmem:[#allocation2 + $0x10] sm:$0xff] }
  0x93   : > { %1325 = vmatpush3.bf16.msra.mxu0 %v1324_v12  ;;  %v1342_v53 = vpack.c.bf16 %v456_v51, %v455_v50  ;;  %v458_v56 = vld [vmem:[#allocation2 + $0x18] sm:$0xff]  ;;  %v459_v59 = vld [vmem:[#allocation2 + $0x20] sm:$0xff]  ;;  %v460_v60 = vld [vmem:[#allocation2 + $0x28] sm:$0xff] }
  0x94   : > { %1326 = vmatprep.subr.bf16.mxu0 %v1676_v1  ;;  %1370 = vmatpush3.bf16.msra.mxu1 %v1369_v33  ;;  %v1345_v58 = vpack.c.bf16 %v458_v56, %v457_v55  ;;  %v1348_v61 = vpack.c.bf16 %v460_v60, %v459_v59  ;;  %v461_v62 = vld [vmem:[#allocation2 + $0x30] sm:$0xff]  ;;  %v462_v63 = vld [vmem:[#allocation2 + $0x38] sm:$0xff]  ;;  %v463_v2 = vld [vmem:[#allocation2 + $0x40] sm:$0xff] }
  0x95   : > { %1371 = vmatprep.subr.bf16.mxu1 %v1676_v1  ;;  %v1351_v0 = vpack.c.bf16 %v462_v63, %v461_v62  ;;  %v464_v3 = vld [vmem:[#allocation2 + $0x48] sm:$0xff]  ;;  %v465_v5 = vld [vmem:[#allocation2 + $0x50] sm:$0xff]  ;;  %v466_v6 = vld [vmem:[#allocation2 + $0x58] sm:$0xff] }
  0x96   : > { %v1354_v4 = vpack.c.bf16 %v464_v3, %v463_v2  ;;  %v1357_v7 = vpack.c.bf16 %v466_v6, %v465_v5  ;;  %v467_v9 = vld [vmem:[#allocation2 + $0x60] sm:$0xff]  ;;  %v468_v10 = vld [vmem:[#allocation2 + $0x68] sm:$0xff]  ;;  %v469_v12 = vld [vmem:[#allocation2 + $0x70] sm:$0xff] }
  0x97   : > { %1328 = vmatpush3.bf16.msra.mxu0 %v1327_v15  ;;  %v1360_v11 = vpack.c.bf16 %v468_v10, %v467_v9  ;;  %v470_v13 = vld [vmem:[#allocation2 + $0x78] sm:$0xff]  ;;  %v445_v15 = vld [vmem:[%s436_s19] sm:$0xff]  ;;  %v644_v16 = vld [vmem:[#allocation6 + $0x70] sm:$0xff] }
  0x98   : > { %1329 = vmatprep.subr.bf16.mxu0 %v1676_v1  ;;  %1373 = vmatpush3.bf16.msra.mxu1 %v1372_v36  ;;  %v1363_v14 = vpack.c.bf16 %v470_v13, %v469_v12  ;;  %v645_v17 = vld [vmem:[#allocation6 + $0x78] sm:$0xff]  ;;  %v726_v19 = vld [vmem:[#allocation7] sm:$0xff]  ;;  %v727_v20 = vld [vmem:[#allocation7 + $0x8] sm:$0xff] }
  0x99   : > { %1374 = vmatprep.subr.bf16.mxu1 %v1676_v1  ;;  %v728_v25 = vld [vmem:[#allocation7 + $0x10] sm:$0xff]  ;;  %v729_v26 = vld [vmem:[#allocation7 + $0x18] sm:$0xff]  ;;  %v730_v29 = vld [vmem:[#allocation7 + $0x20] sm:$0xff] }
  0x9a   : > { %v1393_v28 = vpack.c.bf16 %v729_v26, %v728_v25  ;;  %v731_v30 = vld [vmem:[#allocation7 + $0x28] sm:$0xff]  ;;  %v732_v32 = vld [vmem:[#allocation7 + $0x30] sm:$0xff]  ;;  %v733_v33 = vld [vmem:[#allocation7 + $0x38] sm:$0xff] }
  0x9b   : > { %1331 = vmatpush3.bf16.msra.mxu0 %v1330_v18  ;;  %v1387_v18 = vpack.c.bf16 %v645_v17, %v644_v16  ;;  %v1396_v31 = vpack.c.bf16 %v731_v30, %v730_v29  ;;  %v1399_v34 = vpack.c.bf16 %v733_v33, %v732_v32  ;;  %v734_v35 = vld [vmem:[#allocation7 + $0x40] sm:$0xff]  ;;  %v735_v36 = vld [vmem:[#allocation7 + $0x48] sm:$0xff]  ;;  %v737_v38 = vld [vmem:[#allocation7 + $0x58] sm:$0xff] }
  0x9c   : > { %1332 = vmatprep.subr.bf16.mxu0 %v1676_v1  ;;  %1376 = vmatpush3.bf16.msra.mxu1 %v1375_v39  ;;  %v1402_v37 = vpack.c.bf16 %v735_v36, %v734_v35  ;;  %v738_v40 = vld [vmem:[#allocation7 + $0x60] sm:$0xff]  ;;  %v739_v41 = vld [vmem:[#allocation7 + $0x68] sm:$0xff]  ;;  %v740_v43 = vld [vmem:[#allocation7 + $0x70] sm:$0xff] }
  0x9d   : > { %1377 = vmatprep.subr.bf16.mxu1 %v1676_v1  ;;  %v741_v44 = vld [vmem:[#allocation7 + $0x78] sm:$0xff]  ;;  %v822_v46 = vld [vmem:[#allocation9] sm:$0xff]  ;;  %v823_v47 = vld [vmem:[#allocation9 + $0x8] sm:$0xff] }
  0x9e   : > { %v1414_v49 = vpack.c.bf16 %v823_v47, %v822_v46  ;;  %v825_v50 = vld [vmem:[#allocation9 + $0x18] sm:$0xff]  ;;  %v828_v55 = vld [vmem:[#allocation9 + $0x30] sm:$0xff]  ;;  %v831_v59 = vld [vmem:[#allocation9 + $0x48] sm:$0xff] }
  0x9f   : > { %1334 = vmatpush3.bf16.msra.mxu0 %v1333_v21  ;;  %v829_v56 = vld [vmem:[#allocation9 + $0x38] sm:$0xff]  ;;  %v835_v2 = vld [vmem:[#allocation9 + $0x68] sm:$0xff] }
  0xa0   : > { %1335 = vmatprep.subr.bf16.mxu0 %v1676_v1  ;;  %1379 = vmatpush3.bf16.msra.mxu1 %v1378_v42  ;;  %v1408_v42 = vpack.c.bf16 %v739_v41, %v738_v40  ;;  %v833_v62 = vld [vmem:[#allocation9 + $0x58] sm:$0xff] }
  0xa1   : > { %1380 = vmatprep.subr.bf16.mxu1 %v1676_v1  ;;  %v837_v12 = vld [vmem:[#allocation9 + $0x78] sm:$0xff] }
  0xa3   : > { %1337 = vmatpush3.bf16.msra.mxu0 %v1336_v24  ;;  %v1390_v24 = vpack.c.bf16 %v727_v20, %v726_v19  ;;  %v1054_v19 = vld [vmem:[%s1994_s9] ss:$0 sm:$0xff] }
  0xa4   : > { %1338 = vmatprep.subr.bf16.mxu0 %v1676_v1  ;;  %1382 = vmatpush3.bf16.msra.mxu1 %v1381_v45  ;;  %v1411_v45 = vpack.c.bf16 %v741_v44, %v740_v43 }
  0xa5   : > { %1383 = vmatprep.subr.bf16.mxu1 %v1676_v1 }
  0xa7   : > { %1340 = vmatpush3.bf16.msra.mxu0 %v1339_v27 }
  0xa8   : > { %1341 = vmatprep.subr.bf16.mxu0 %v1676_v1  ;;  %1385 = vmatpush3.bf16.msra.mxu1 %v1384_v48  ;;  %v824_v48 = vld [vmem:[#allocation9 + $0x10] sm:$0xff] }
  0xa9   : > { %1386 = vmatprep.subr.bf16.mxu1 %v1676_v1  ;;  %v1417_v51 = vpack.c.bf16 %v825_v50, %v824_v48 }
  0xac   : > { %1388 = vmatpush3.bf16.msra.mxu1 %v1387_v18 }
  0xad   : > { %1389 = vmatprep.subr.bf16.mxu1 %v1676_v1 }
 0x10c   : > { %v451_v54 = vpop.permute.xlu0 %450 }
 0x10d   : > { %vm452_vm1 = vcmp.eq.s32.totalorder %v451_v54, %v448_v52  ;;  %v826_v52 = vld [vmem:[#allocation9 + $0x20] sm:$0xff] }
 0x10e   : > { %1175 = vmatmul.mubr.msk.f32.vlgmr.msra.gmra.mrb[0].mxu0 %vm452_vm1, %v1679_v57  ;;  %v1423_v57 = vpack.c.bf16 %v829_v56, %v828_v55 }
 0x10f   : > { %1343 = vmatpush3.bf16.msra.mxu0 %v1342_v53  ;;  %1209 = vmatprep.mubr.msk.f32.mxu0 %vm1677_vm0, %v1678_v8  ;;  %v827_v53 = vld [vmem:[#allocation9 + $0x28] sm:$0xff] }
 0x110   : > { %1344 = vmatprep.subr.bf16.mxu0 %v1676_v1  ;;  %v1420_v54 = vpack.c.bf16 %v827_v53, %v826_v52 }
 0x113   : > { %1346 = vmatpush3.bf16.msra.mxu0 %v1345_v58  ;;  %v830_v58 = vld [vmem:[#allocation9 + $0x40] sm:$0xff] }
 0x114   : > { %1347 = vmatprep.subr.bf16.mxu0 %v1676_v1  ;;  %v1426_v60 = vpack.c.bf16 %v831_v59, %v830_v58 }
 0x117   : > { %1349 = vmatpush3.bf16.msra.mxu0 %v1348_v61  ;;  %v832_v61 = vld [vmem:[#allocation9 + $0x50] sm:$0xff] }
 0x118   : > { %1350 = vmatprep.subr.bf16.mxu0 %v1676_v1  ;;  %v1429_v63 = vpack.c.bf16 %v833_v62, %v832_v61 }
 0x11b   : > { %1352 = vmatpush3.bf16.msra.mxu0 %v1351_v0  ;;  %v834_v0 = vld [vmem:[#allocation9 + $0x60] sm:$0xff] }
 0x11c   : > { %1353 = vmatprep.subr.bf16.mxu0 %v1676_v1  ;;  %v1432_v3 = vpack.c.bf16 %v835_v2, %v834_v0 }
 0x11f   : > { %1355 = vmatpush3.bf16.msra.mxu0 %v1354_v4  ;;  %v1052_v4 = vld [vmem:[%s1990_s5] ss:$0 sm:$0xff] }
 0x120   : > { %1356 = vmatprep.subr.bf16.mxu0 %v1676_v1 }
 0x123   : > { %1358 = vmatpush3.bf16.msra.mxu0 %v1357_v7 }
 0x124   : > { %1359 = vmatprep.subr.bf16.mxu0 %v1676_v1 }
 0x127   : > { %1361 = vmatpush3.bf16.msra.mxu0 %v1360_v11  ;;  %v836_v11 = vld [vmem:[#allocation9 + $0x70] sm:$0xff] }
 0x128   : > { %1362 = vmatprep.subr.bf16.mxu0 %v1676_v1  ;;  %v1435_v13 = vpack.c.bf16 %v837_v12, %v836_v11 }
 0x12b   : > { %1364 = vmatpush3.bf16.msra.mxu0 %v1363_v14 }
 0x12c   : > { %1413 = vmatprep.subr.bf16.mxu0 %v1676_v1 }
 0x12e   : > { %1210 = vmatmul.mubr.f32.vlgmr.msra.gmra.mrb[0].mxu0 %v445_v15 }
 0x12f   : > { %1314 = vmatprep.mubr.msk.f32.mxu0 %vm1677_vm0, %v1678_v8  ;;  %1415 = vmatpush3.bf16.msra.mxu0 %v1414_v49 }
 0x130   : > { %1416 = vmatprep.subr.bf16.mxu0 %v1676_v1 }
 0x133   : > { %1418 = vmatpush3.bf16.msra.mxu0 %v1417_v51 }
 0x134   : > { %1419 = vmatprep.subr.bf16.mxu0 %v1676_v1 }
 0x137   : > { %1421 = vmatpush3.bf16.msra.mxu0 %v1420_v54 }
 0x138   : > { %1422 = vmatprep.subr.bf16.mxu0 %v1676_v1 }
 0x13b   : > { %1424 = vmatpush3.bf16.msra.mxu0 %v1423_v57 }
 0x13c   : > { %1425 = vmatprep.subr.bf16.mxu0 %v1676_v1 }
 0x13f   : > { %1427 = vmatpush3.bf16.msra.mxu0 %v1426_v60 }
 0x140   : > { %1428 = vmatprep.subr.bf16.mxu0 %v1676_v1 }
 0x143   : > { %1430 = vmatpush3.bf16.msra.mxu0 %v1429_v63 }
 0x144   : > { %1431 = vmatprep.subr.bf16.mxu0 %v1676_v1 }
 0x147   : > { %1433 = vmatpush3.bf16.msra.mxu0 %v1432_v3 }
 0x148   : > { %1434 = vmatprep.subr.bf16.mxu0 %v1676_v1 }
 0x14b   : > { %1436 = vmatpush3.bf16.msra.mxu0 %v1435_v13 }
 0x201   : > { %v623_v21 = vpop.f32.mrb[0].mxu0 }
 0x202   : > { %vm627_vm2 = vcmp.ge.f32.partialorder %v623_v21, 0.0  ;;  %v628_v22 = vmul.f32 0.2, %v623_v21  ;;  %v1211_v23 = vpop.f32.mrb[1].mxu0 }
 0x204   : > { %v629_v27 = vsel %vm627_vm2, %v623_v21, %v628_v22 }
 0x205   : > { %1245 = vmatmul.mubr.f32.vlgmr.msra.gmra.mrb[0].mxu1 %v629_v27 }
 0x206   : > { %1391 = vmatpush3.bf16.msra.mxu1 %v1390_v24  ;;  %1279 = vmatprep.mubr.msk.f32.mxu1 %vm1677_vm0, %v1678_v8  ;;  %v736_v8 = vld [vmem:[#allocation7 + $0x50] sm:$0xff] }
 0x207   : > { %1392 = vmatprep.subr.bf16.mxu1 %v1676_v1  ;;  %v1405_v39 = vpack.c.bf16 %v737_v38, %v736_v8 }
 0x20a   : > { %1394 = vmatpush3.bf16.msra.mxu1 %v1393_v28 }
 0x20b   : > { %1395 = vmatprep.subr.bf16.mxu1 %v1676_v1 }
 0x20e   : > { %1397 = vmatpush3.bf16.msra.mxu1 %v1396_v31 }
 0x20f   : > { %1398 = vmatprep.subr.bf16.mxu1 %v1676_v1 }
 0x212   : > { %1400 = vmatpush3.bf16.msra.mxu1 %v1399_v34 }
 0x213   : > { %1401 = vmatprep.subr.bf16.mxu1 %v1676_v1 }
 0x216   : > { %1403 = vmatpush3.bf16.msra.mxu1 %v1402_v37 }
 0x217   : > { %1404 = vmatprep.subr.bf16.mxu1 %v1676_v1 }
 0x21a   : > { %1406 = vmatpush3.bf16.msra.mxu1 %v1405_v39 }
 0x21b   : > { %1407 = vmatprep.subr.bf16.mxu1 %v1676_v1 }
 0x21e   : > { %1409 = vmatpush3.bf16.msra.mxu1 %v1408_v42 }
 0x21f   : > { %1410 = vmatprep.subr.bf16.mxu1 %v1676_v1  ;;  %v1053_v1 = vld [vmem:[%s1992_s7] ss:$0 sm:$0xff] }
 0x222   : > { %1412 = vmatpush3.bf16.msra.mxu1 %v1411_v45 }
 0x2d8   : > { %v719_v5 = vpop.f32.mrb[0].mxu1 }
 0x2d9   : > { %v720_v6 = vadd.f32 %v1052_v4, %v719_v5  ;;  %v1246_v7 = vpop.f32.mrb[1].mxu1 }
 0x2db   : > { %vm723_vm3 = vcmp.ge.f32.partialorder %v720_v6, 0.0  ;;  %v724_v9 = vmul.f32 0.2, %v720_v6 }
 0x2dd   : > { %v725_v10 = vsel %vm723_vm3, %v720_v6, %v724_v9 }
 0x2de   : > { %1280 = vmatmul.mubr.f32.vlgmr.msra.gmra.mrb[2].mxu1 %v725_v10 }
 0x3b1   : > { %v815_v14 = vpop.f32.mrb[2].mxu1 }
 0x3b2   : > { %v816_v15 = vadd.f32 %v1053_v1, %v815_v14  ;;  %v1281_v16 = vpop.f32.mrb[3].mxu1 }
 0x3b4   : > { %vm819_vm4 = vcmp.ge.f32.partialorder %v816_v15, 0.0  ;;  %v820_v17 = vmul.f32 0.2, %v816_v15 }
 0x3b6   : > { %v821_v18 = vsel %vm819_vm4, %v816_v15, %v820_v17 }
 0x3b7   : > { %1315 = vmatmul.mubr.f32.vlgmr.msra.gmra.mrb[2].mxu0 %v821_v18 }
 0x48a   : > { %v911_v20 = vpop.f32.mrb[2].mxu0 }
 0x48b   : > { %v912_v21 = vadd.f32 %v1054_v19, %v911_v20  ;;  %v1316_v22 = vpop.f32.mrb[3].mxu0 }
 0x48d   : > { %1506 = vtanh.f32 %v912_v21 }
 0x497   : > { %v1507_v23 = vpop.eup %1506 }
 0x498   : > { %916 = vst [vmem:[%s444_s12] sm:$0xff] %v1507_v23 }
 0x499 PF: > { %s23_s13 = sadd.s32 1, %s1666_s13  }
 0x49a   : > { %p20_p6 = scmp.ge.s32.totalorder %s23_s13, 4  }
 0x49c   :  { %22 = sbr.rel (!%p20_p6) target bundleno = 3 (0x3), region = 114 }
 0x4a3   :  { %936 = vsyncpa [#allocation3], 1 }
 0x4a4   :  { %938 = vsyncpa [#allocation3 + $0x1], 1 }
 0x4a5   :  { %939 = vsyncpa [#allocation5], 1 }
 0x4a6   :  { %940 = vsyncpa [#allocation8], 1 }

</bundles_post_ra>
